<compile_context>
chip_gen: v7x
topology: tpu7x:2x2x1
jax: 0.10.0
libtpu: 0.0.40
codegen_flags: <defaults>
</compile_context>

<pallas_src>
import functools
import math

import jax
import jax.numpy as jnp
from jax import lax
from jax.experimental import pallas as pl
from jax.experimental.pallas import tpu as pltpu


_VMEM_LIMIT = 32 * 1024 * 1024  # safe on v5e/v6e (128 MiB) and v7x (64 MiB physical)


# ---------------------------------------------------------------------------
# Row-tiled Linear:  out = x @ w_t + b      (w_t is (in, out), weights resident)
# ---------------------------------------------------------------------------

def _linear_kernel(x_ref, w_ref, b_ref, o_ref):
    o_ref[...] = (jnp.dot(x_ref[...], w_ref[...],
                          preferred_element_type=jnp.float32)
                  + b_ref[...]).astype(o_ref.dtype)


def pallas_linear(x2d, w_t, b, *, tile_m=256):
    m, k = x2d.shape
    o = w_t.shape[1]
    tm = m if m <= tile_m else tile_m
    return pl.pallas_call(
        _linear_kernel,
        out_shape=jax.ShapeDtypeStruct((m, o), x2d.dtype),
        grid=(pl.cdiv(m, tm),),
        in_specs=[pl.BlockSpec((tm, k), lambda i: (i, 0)),
                  pl.BlockSpec((k, o), lambda i: (0, 0)),
                  pl.BlockSpec((1, o), lambda i: (0, 0))],
        out_specs=pl.BlockSpec((tm, o), lambda i: (i, 0)),
        compiler_params=pltpu.CompilerParams(
            dimension_semantics=("parallel",),
            vmem_limit_bytes=_VMEM_LIMIT),
    )(x2d, w_t, b.reshape(1, o))


# ---------------------------------------------------------------------------
# Fused LayerNorm + two projections (rpe_k / rpe_v), row-tiled
# ---------------------------------------------------------------------------

def _ln_dual_proj_kernel(x_ref, g_ref, b_ref, wk_ref, bk_ref, wv_ref, bv_ref,
                         ok_ref, ov_ref, *, eps):
    x = x_ref[...].astype(jnp.float32)
    mean = jnp.mean(x, axis=-1, keepdims=True)
    xc = x - mean
    var = jnp.mean(xc * xc, axis=-1, keepdims=True)
    y = xc * lax.rsqrt(var + eps) * g_ref[...] + b_ref[...]
    ok_ref[...] = (jnp.dot(y, wk_ref[...], preferred_element_type=jnp.float32)
                   + bk_ref[...]).astype(ok_ref.dtype)
    ov_ref[...] = (jnp.dot(y, wv_ref[...], preferred_element_type=jnp.float32)
                   + bv_ref[...]).astype(ov_ref.dtype)


def pallas_ln_dual_linear(x2d, gamma, beta, wk_t, bk, wv_t, bv, *, eps=1e-5, tile_m=256):
    m, c = x2d.shape
    o = wk_t.shape[1]
    tm = m if m <= tile_m else tile_m
    row_in = pl.BlockSpec((tm, c), lambda i: (i, 0))
    vec_c = pl.BlockSpec((1, c), lambda i: (0, 0))
    mat = pl.BlockSpec((c, o), lambda i: (0, 0))
    vec_o = pl.BlockSpec((1, o), lambda i: (0, 0))
    row_out = pl.BlockSpec((tm, o), lambda i: (i, 0))
    return pl.pallas_call(
        functools.partial(_ln_dual_proj_kernel, eps=eps),
        out_shape=(jax.ShapeDtypeStruct((m, o), x2d.dtype),
                   jax.ShapeDtypeStruct((m, o), x2d.dtype)),
        grid=(pl.cdiv(m, tm),),
        in_specs=[row_in, vec_c, vec_c, mat, vec_o, mat, vec_o],
        out_specs=(row_out, row_out),
        compiler_params=pltpu.CompilerParams(
            dimension_semantics=("parallel",),
            vmem_limit_bytes=_VMEM_LIMIT),
    )(x2d, gamma.reshape(1, c), beta.reshape(1, c),
      wk_t, bk.reshape(1, o), wv_t, bv.reshape(1, o))


# ---------------------------------------------------------------------------
# Neighborhood (rpe) attention — banded formulation, one batch per grid step,
# all heads packed on the lane axis.
# ---------------------------------------------------------------------------

def _na1d_kernel(qh_ref, kh_ref, vh_ref, rpek_ref, rpev_ref, o_ref,
                 spad_ref, vpad_ref, *, L, H, D, W, scale_mul):
    N = L * L
    C = H * D
    pad = W // 2
    front = ((pad + 7) // 8) * 8          # sublane-aligned front padding for the buffers

    qc = qh_ref[0].astype(jnp.float32)    # (L, C)   channels = head-major (h*D + d)
    kc = kh_ref[0].astype(jnp.float32)
    vc = vh_ref[0].astype(jnp.float32)
    rk = rpek_ref[0].astype(jnp.float32)  # (L, L, C)
    rv = rpev_ref[0].astype(jnp.float32)

    # reference: q1[n]=q[i], k1[n]=k[i]+rpe_k[i,j], v1[n]=v[i]+rpe_v[i,j], n=i*L+j
    k1 = kc[:, None, :] + rk              # (L, L, C)
    v1 = vc[:, None, :] + rv
    prod = qc[:, None, :] * k1            # q1 * k1, per channel
    prod2 = prod.reshape(N, C)
    v1f = v1.reshape(N, C)

    # per-head score s[n,h] = sum_d prod2[n, h*D+d], replicated across the head's D lanes
    parts = []
    for h in range(H):
        sh = jnp.sum(prod2[:, h * D:(h + 1) * D], axis=-1, keepdims=True)  # (N, 1)
        parts.append(jnp.broadcast_to(sh, (N, D)))
    sC = jnp.concatenate(parts, axis=1) * scale_mul                        # (N, C)

    # zero-padded flattened score / value buffers (padding rows == F.pad zeros exactly)
    spad_ref[...] = jnp.zeros_like(spad_ref)
    vpad_ref[...] = jnp.zeros_like(vpad_ref)
    spad_ref[pl.ds(front, N), :] = sC
    vpad_ref[pl.ds(front, N), :] = v1f

    # banded softmax over the window: W shifted views instead of a dense (N, N) matrix
    base = front - pad
    row_max = spad_ref[pl.ds(base, N), :]
    for w in range(1, W):
        row_max = jnp.maximum(row_max, spad_ref[pl.ds(base + w, N), :])

    den = jnp.zeros((N, C), jnp.float32)
    acc = jnp.zeros((N, C), jnp.float32)
    for w in range(W):
        e = jnp.exp(spad_ref[pl.ds(base + w, N), :] - row_max)
        den = den + e
        acc = acc + e * vpad_ref[pl.ds(base + w, N), :]

    out_flat = acc * pl.reciprocal(den, approx=True)                       # (N, C)
    qv = jnp.sum(out_flat.reshape(L, L, C), axis=1)                        # sum over j
    o_ref[0] = qv.astype(o_ref.dtype)


def pallas_neighborhood_attention(qh, kh, vh, rpe_k, rpe_v, *, num_heads,
                                  window_size, scale_mul):
    B, L, C = qh.shape
    N = L * L
    D = C // num_heads
    pad = window_size // 2
    front = ((pad + 7) // 8) * 8
    # TODO(synk): for very large L, additionally tile the flattened N = L*L axis
    # (flash-style running max/denominator) so the per-batch block stays in VMEM.
    kernel = functools.partial(_na1d_kernel, L=L, H=num_heads, D=D,
                               W=window_size, scale_mul=scale_mul)
    return pl.pallas_call(
        kernel,
        out_shape=jax.ShapeDtypeStruct((B, L, C), qh.dtype),
        grid=(B,),
        in_specs=[pl.BlockSpec((1, L, C), lambda b: (b, 0, 0)),
                  pl.BlockSpec((1, L, C), lambda b: (b, 0, 0)),
                  pl.BlockSpec((1, L, C), lambda b: (b, 0, 0)),
                  pl.BlockSpec((1, L, L, C), lambda b: (b, 0, 0, 0)),
                  pl.BlockSpec((1, L, L, C), lambda b: (b, 0, 0, 0))],
        out_specs=pl.BlockSpec((1, L, C), lambda b: (b, 0, 0)),
        scratch_shapes=[pltpu.VMEM((front + N + pad, C), jnp.float32),
                        pltpu.VMEM((front + N + pad, C), jnp.float32)],
        compiler_params=pltpu.CompilerParams(
            dimension_semantics=("parallel",),
            vmem_limit_bytes=_VMEM_LIMIT),
    )(qh, kh, vh, rpe_k, rpe_v)


# ---------------------------------------------------------------------------
# Plain multi-head attention (rpe is None) — one batch per grid step, heads packed
# on the lane axis, optional int8 mask, no mask materialization when None.
# ---------------------------------------------------------------------------

def _mha_kernel(*refs, H, D, scale, with_mask):
    if with_mask:
        q_ref, k_ref, v_ref, m_ref, o_ref = refs
    else:
        q_ref, k_ref, v_ref, o_ref = refs
        m_ref = None
    qh = q_ref[0].astype(jnp.float32)   # (L, C)
    kh = k_ref[0].astype(jnp.float32)   # (T, C)
    vh = v_ref[0].astype(jnp.float32)   # (T, C)
    mk = m_ref[0].astype(jnp.float32) if with_mask else None   # (H, L, T)

    outs = []
    for h in range(H):
        q = qh[:, h * D:(h + 1) * D]
        k = kh[:, h * D:(h + 1) * D]
        v = vh[:, h * D:(h + 1) * D]
        s = lax.dot_general(q, k, dimension_numbers=(((1,), (1,)), ((), ())),
                            preferred_element_type=jnp.float32) * scale
        if mk is not None:
            s = jnp.where(mk[h] == 0.0, jnp.float32(-1e20), s)
        mx = jnp.max(s, axis=-1, keepdims=True)
        e = jnp.exp(s - mx)
        den = jnp.sum(e, axis=-1, keepdims=True)
        o = jnp.dot(e, v, preferred_element_type=jnp.float32)
        outs.append(o * pl.reciprocal(den, approx=True))
    o_ref[0] = jnp.concatenate(outs, axis=1).astype(o_ref.dtype)


def pallas_mha(qh, kh, vh, mask, *, num_heads, scale):
    B, L, C = qh.shape
    T = kh.shape[1]
    D = C // num_heads
    with_mask = mask is not None
    # TODO(synk): for long T, tile the key/value axis flash-style (running max/denominator)
    # instead of loading the full (T, C) block per step.
    kernel = functools.partial(_mha_kernel, H=num_heads, D=D, scale=scale,
                               with_mask=with_mask)
    in_specs = [pl.BlockSpec((1, L, C), lambda b: (b, 0, 0)),
                pl.BlockSpec((1, T, C), lambda b: (b, 0, 0)),
                pl.BlockSpec((1, T, C), lambda b: (b, 0, 0))]
    args = [qh, kh, vh]
    if with_mask:
        in_specs.append(pl.BlockSpec((1, num_heads, L, T), lambda b: (b, 0, 0, 0)))
        args.append(mask)
    return pl.pallas_call(
        kernel,
        out_shape=jax.ShapeDtypeStruct((B, L, C), qh.dtype),
        grid=(B,),
        in_specs=in_specs,
        out_specs=pl.BlockSpec((1, L, C), lambda b: (b, 0, 0)),
        compiler_params=pltpu.CompilerParams(
            dimension_semantics=("parallel",),
            vmem_limit_bytes=_VMEM_LIMIT),
    )(*args)


# ---------------------------------------------------------------------------
# Module wrapper (parameter setup, reshapes — all heavy work inside Pallas kernels)
# ---------------------------------------------------------------------------

class RefactorNeighborhoodAttention1D:
    def __init__(self, dim, num_heads, dropout, *, key):
        assert dim % num_heads == 0
        self.dim = dim
        self.num_heads = num_heads
        self.head_dim = dim // num_heads
        self.scale = self.head_dim ** (-0.5)
        self.dropout = dropout  # identity (eval / deterministic)

        ks = jax.random.split(key, 9)
        bound = 1.0 / math.sqrt(dim)

        def u(k, shape):
            return jax.random.uniform(k, shape, jnp.float32, -bound, bound)

        # PyTorch nn.Linear convention: weight shape (out_features, in_features)
        self.w_q = u(ks[0], (dim, dim))
        self.w_k = u(ks[1], (dim, dim))
        self.w_v = u(ks[2], (dim, dim))
        self.ln_g = jnp.ones((dim,), jnp.float32)
        self.ln_b = jnp.zeros((dim,), jnp.float32)
        self.proj_w = u(ks[3], (dim, dim))
        self.proj_b = u(ks[4], (dim,))
        self.rpe_k_w = u(ks[5], (dim, dim))
        self.rpe_k_b = u(ks[6], (dim,))
        self.rpe_v_w = u(ks[7], (dim, dim))
        self.rpe_v_b = u(ks[8], (dim,))
        self._zero_b = jnp.zeros((dim,), jnp.float32)

        # pre-transposed copies ((in, out)) so kernels compute x @ w_t with no runtime transpose
        self.w_q_t = self.w_q.T
        self.w_k_t = self.w_k.T
        self.w_v_t = self.w_v.T
        self.proj_w_t = self.proj_w.T
        self.rpe_k_w_t = self.rpe_k_w.T
        self.rpe_v_w_t = self.rpe_v_w.T

    def __call__(self, Q, K, V, rpe=None, window_size=15, attention_mask=None):
        if Q.ndim != 3 or K.ndim != 3 or V.ndim != 3:
            raise ValueError("NeighborhoodAttention1D expected rank-3 inputs")
        B, L, C = Q.shape
        _, T, _ = K.shape
        H, D = self.num_heads, self.head_dim

        # Projections (no bias).
        q = pallas_linear(Q.reshape(B * L, C), self.w_q_t, self._zero_b)
        k = pallas_linear(K.reshape(B * T, C), self.w_k_t, self._zero_b)
        v = pallas_linear(V.reshape(B * T, C), self.w_v_t, self._zero_b)

        # PyTorch "reinterpretation" reshape to (B, H, len, D), then pack heads on the
        # channel axis (head-major) so the kernels are lane-dense.  These tensors are
        # small (B*len*C) — the transpose cost is negligible.
        qh = q.reshape(B, H, L, D).transpose(0, 2, 1, 3).reshape(B, L, C)
        kh = k.reshape(B, H, T, D).transpose(0, 2, 1, 3).reshape(B, T, C)
        vh = v.reshape(B, H, T, D).transpose(0, 2, 1, 3).reshape(B, T, C)

        if rpe is not None:
            assert window_size % 2 == 1, "reference unfold semantics require odd window"
            assert T == L, "rpe branch requires key length == query length"
            # Fused LayerNorm + rpe_k / rpe_v projections, one pass over the big activation.
            rpe_k, rpe_v = pallas_ln_dual_linear(
                rpe.reshape(B * L * L, C), self.ln_g, self.ln_b,
                self.rpe_k_w_t, self.rpe_k_b, self.rpe_v_w_t, self.rpe_v_b)
            # Channels are already head-major (h*D + d); keep the natural (B,L,L,C) layout.
            rpe_k = rpe_k.reshape(B, L, L, C)
            rpe_v = rpe_v.reshape(B, L, L, C)

            # NOTE: reference divides by self.scale (= head_dim**-0.5), i.e. *multiplies*
            # the raw dot product by sqrt(head_dim).  Reproduced exactly.
            qv = pallas_neighborhood_attention(
                qh, kh, vh, rpe_k, rpe_v, num_heads=H,
                window_size=window_size, scale_mul=1.0 / self.scale)
            # attn_drop: identity (eval)
        else:
            if attention_mask is not None:
                mask = jnp.broadcast_to(attention_mask != 0, (B, H, L, T)).astype(jnp.int8)
            else:
                mask = None
            qv = pallas_mha(qh, kh, vh, mask, num_heads=H, scale=1.0 / math.sqrt(D))
            # attn_drop: identity (eval)

        out = pallas_linear(qv.reshape(B * L, C), self.proj_w_t, self.proj_b).reshape(B, L, C)
        # proj_drop: identity (eval)
        return out


# ---------------------------------------------------------------------------
# Pure-JAX reference (literal mirror of the PyTorch forward) for validation
# ---------------------------------------------------------------------------

def reference_forward(mod, Q, K, V, rpe=None, window_size=15, attention_mask=None):
    B, L, C = Q.shape
    _, T, _ = K.shape
    H, D = mod.num_heads, mod.head_dim
    q = (Q.reshape(B * L, C) @ mod.w_q.T).reshape(B, H, L, D)
    k = (K.reshape(B * T, C) @ mod.w_k.T).reshape(B, H, T, D)
    v = (V.reshape(B * T, C) @ mod.w_v.T).reshape(B, H, T, D)
    if rpe is not None:
        mean = rpe.mean(-1, keepdims=True)
        var = ((rpe - mean) ** 2).mean(-1, keepdims=True)
        x = (rpe - mean) / jnp.sqrt(var + 1e-5) * mod.ln_g + mod.ln_b
        rk = (x.reshape(B * L * L, C) @ mod.rpe_k_w.T + mod.rpe_k_b)
        rv = (x.reshape(B * L * L, C) @ mod.rpe_v_w.T + mod.rpe_v_b)
        rk = rk.reshape(B, L, L, H, D).transpose(0, 3, 1, 2, 4)
        rv = rv.reshape(B, L, L, H, D).transpose(0, 3, 1, 2, 4)
        q1 = jnp.broadcast_to(q[:, :, :, None, :], (B, H, L, L, D)).reshape(B, H, L * L, D)
        k1 = (k[:, :, :, None, :] + rk).reshape(B, H, L * L, D)
        v1 = (v[:, :, :, None, :] + rv).reshape(B, H, L * L, D)
        pad = window_size // 2
        qp = jnp.pad(q1, ((0, 0), (0, 0), (pad, pad), (0, 0)))
        kp = jnp.pad(k1, ((0, 0), (0, 0), (pad, pad), (0, 0)))
        vp = jnp.pad(v1, ((0, 0), (0, 0), (pad, pad), (0, 0)))
        idx = jnp.arange(L * L)[:, None] + jnp.arange(window_size)[None, :]
        Qw, Kw, Vw = qp[:, :, idx, :], kp[:, :, idx, :], vp[:, :, idx, :]
        attn = (Qw * Kw).sum(-1) / mod.scale
        attn = jax.nn.softmax(attn, axis=-1)
        qv = (attn[..., None] * Vw).sum(-2).reshape(B, H, L, L, D).sum(-2)
        qv = qv.transpose(0, 2, 1, 3).reshape(B, L, C)
    else:
        aw = jnp.einsum("bhld,bhtd->bhlt", q, k) / math.sqrt(D)
        if attention_mask is not None:
            m = jnp.broadcast_to(attention_mask, aw.shape)
            aw = jnp.where(m == 0, -1e20, aw)
        aw = jax.nn.softmax(aw, axis=-1)
        qv = jnp.einsum("bhlt,bhtd->bhld", aw, v).transpose(0, 2, 1, 3).reshape(B, L, C)
    return (qv.reshape(B * L, C) @ mod.proj_w.T + mod.proj_b).reshape(B, L, C)


if __name__ == "__main__":
    key = jax.random.PRNGKey(0)
    kp, kq, kk, kv, kr, km = jax.random.split(key, 6)
    B, L, dim, heads, window = 2, 8, 32, 4, 15

    mod = RefactorNeighborhoodAttention1D(dim, heads, dropout=0.0, key=kp)

    Q = jax.random.normal(kq, (B, L, dim), jnp.float32)
    K = jax.random.normal(kk, (B, L, dim), jnp.float32)
    V = jax.random.normal(kv, (B, L, dim), jnp.float32)
    rpe = jax.random.normal(kr, (B, L, L, dim), jnp.float32)
    attn_mask = (jax.random.uniform(km, (B, 1, L, L)) > 0.2).astype(jnp.float32)

    out_rpe = mod(Q, K, V, rpe=rpe, window_size=window)                    # NA branch
    out_std = mod(Q, K, V, rpe=None)                                       # plain attention
    out_msk = mod(Q, K, V, rpe=None, attention_mask=attn_mask)             # masked attention
    jax.block_until_ready((out_rpe, out_std, out_msk))

    with jax.default_matmul_precision("highest"):
        ref_rpe = reference_forward(mod, Q, K, V, rpe=rpe, window_size=window)
        ref_std = reference_forward(mod, Q, K, V, rpe=None)
        ref_msk = reference_forward(mod, Q, K, V, rpe=None, attention_mask=attn_mask)
    jax.block_until_ready((ref_rpe, ref_std, ref_msk))

    assert out_rpe.shape == (B, L, dim)
    assert out_std.shape == (B, L, dim)
    assert out_msk.shape == (B, L, dim)
    err_rpe = float(jnp.max(jnp.abs(out_rpe - ref_rpe)))
    err_std = float(jnp.max(jnp.abs(out_std - ref_std)))
    err_msk = float(jnp.max(jnp.abs(out_msk - ref_msk)))
    assert err_rpe < 2e-2 and err_std < 2e-2 and err_msk < 2e-2, (err_rpe, err_std, err_msk)

    print("KERNEL_OK")
</pallas_src>

<mosaic_0001>
module attributes {stable_mosaic.version = 11 : i64} {
  func.func @_linear_kernel(%arg0: i32, %arg1: memref<16x32xf32, #tpu.memory_space<vmem>>, %arg2: memref<32x32xf32, #tpu.memory_space<vmem>>, %arg3: memref<1x32xf32, #tpu.memory_space<vmem>>, %arg4: memref<16x32xf32, #tpu.memory_space<vmem>>) attributes {dimension_semantics = [#tpu.dimension_semantics<parallel>], iteration_bounds = array<i64: 1>, scalar_prefetch = 0 : i64, scratch_operands = 0 : i64, tpu.core_type = #tpu.core_type<tc>, window_params = [{transform_indices = @transform_0, window_bounds = array<i64: 16, 32>}, {pipeline_mode = #tpu.pipeline_mode<synchronous>, transform_indices = @transform_1, window_bounds = array<i64: 32, 32>}, {pipeline_mode = #tpu.pipeline_mode<synchronous>, transform_indices = @transform_2, window_bounds = array<i64: 1, 32>}, {transform_indices = @transform_3, window_bounds = array<i64: 16, 32>}]} {
    %c0 = arith.constant 0 : index
    %c0_0 = arith.constant 0 : index
    %0 = vector.load %arg1[%c0, %c0_0] : memref<16x32xf32, #tpu.memory_space<vmem>>, vector<16x32xf32>
    %c0_1 = arith.constant 0 : index
    %c0_2 = arith.constant 0 : index
    %1 = vector.load %arg2[%c0_1, %c0_2] : memref<32x32xf32, #tpu.memory_space<vmem>>, vector<32x32xf32>
    %cst = arith.constant dense<0.000000e+00> : vector<16x32xf32>
    %2 = tpu.matmul %0, %1, %cst {dimension_numbers = #tpu.dot_dimension_numbers<[1], [0], [0], [1], [0, 0, 1, 1], [], []>} : vector<16x32xf32>, vector<32x32xf32>, vector<16x32xf32> -> vector<16x32xf32>
    %c0_3 = arith.constant 0 : index
    %c0_4 = arith.constant 0 : index
    %3 = vector.load %arg3[%c0_3, %c0_4] : memref<1x32xf32, #tpu.memory_space<vmem>>, vector<1x32xf32>
    %4 = vector.broadcast %3 : vector<1x32xf32> to vector<16x32xf32>
    %5 = arith.addf %2, %4 : vector<16x32xf32>
    %c0_5 = arith.constant 0 : index
    %c0_6 = arith.constant 0 : index
    %6 = vector.load %arg4[%c0_5, %c0_6] : memref<16x32xf32, #tpu.memory_space<vmem>>, vector<16x32xf32>
    tpu.vector_store %arg4[%c0_5, %c0_6], %5 {strides = array<i32>} : memref<16x32xf32, #tpu.memory_space<vmem>>, vector<16x32xf32>,
    return
  }
  func.func @transform_0(%arg0: i32) -> (i32, i32) {
    %c0_i32 = arith.constant 0 : i32
    %c0_i32_0 = arith.constant 0 : i32
    return %arg0, %c0_i32 : i32, i32
  }
  func.func @transform_1(%arg0: i32) -> (i32, i32) {
    %c0_i32 = arith.constant 0 : i32
    %c0_i32_0 = arith.constant 0 : i32
    %c0_i32_1 = arith.constant 0 : i32
    return %c0_i32, %c0_i32_0 : i32, i32
  }
  func.func @transform_2(%arg0: i32) -> (i32, i32) {
    %c0_i32 = arith.constant 0 : i32
    %c0_i32_0 = arith.constant 0 : i32
    %c0_i32_1 = arith.constant 0 : i32
    return %c0_i32, %c0_i32_0 : i32, i32
  }
  func.func @transform_3(%arg0: i32) -> (i32, i32) {
    %c0_i32 = arith.constant 0 : i32
    %c0_i32_0 = arith.constant 0 : i32
    return %arg0, %c0_i32 : i32, i32
  }
}

</mosaic_0001>

<bundles_post_ra>
// kernel: tpu_custom_call.1
= control target key start
LH: loop header
LB: loop body
LE: loop exit
PB: predicated region body
PF: predicated region fallthrough
CT: control target
= control target key end

     0   :  { %8 = vsyncpa [#allocation3], 0  ;;  %s340_s0 = inlined_call_operand.hbm [shape: f32[16,32], index: 0, kind: input, shape index: {}]   ;;  %s341_s1 = inlined_call_operand.hbm [shape: f32[32,32], index: 1, kind: input, shape index: {}]   ;;  %s342_s2 = inlined_call_operand.vmem [shape: f32[1,32], index: 2, kind: input, shape index: {}]   ;;  %s343_s3 = inlined_call_operand.hbm [shape: f32[16,32], index: 3, kind: output, shape index: {}]  }
   0x1   :  { %9 = vsyncpa [#allocation6], 0 }
   0x2   :  { %10 = vsyncpa [#allocation4], 0  ;;  %s263_s12 = smov [#allocation2]   ;;  %s191_s16 = scalar_lea.hbm %s340_s0, 256 }
   0x3   :  { %s16_s13 = sshll.u32 %s263_s12, 4  ;;  %p192_p0 = scmp.ne.s32.totalorder %s340_s0, %s191_s16  ;;  %s17_s13 = int_to_ptr.vmem [resolvable:$true] %s16_s13 }
   0x4   :  { %p195_p1 = scmp.lt.u32.totalorder %s191_s16, %s340_s0 }
   0x6   :  { %p197_p2 = pnand %p195_p1, %p192_p0 }
   0x8   :  { %200 = shalt.err (!%p197_p2)
}
   0x9   :  { %s201_s21 = scalar_lea.vmem %s17_s13, 256  ;;  %p206_p4 = scmp.lt.s32.totalorder %s17_s13, %s17_s13 }
   0xa   :  { %p202_p3 = scmp.ne.s32.totalorder %s17_s13, %s201_s21  ;;  %p207_p5 = scmp.lt.s32.totalorder %s201_s21, %s201_s21 }
   0xc   :  { %p208_p6 = por %p207_p5, %p206_p4 }
   0xe   :  { %p209_p7 = pnand %p208_p6, %p202_p3 }
  0x10   :  { %212 = shalt.err (!%p209_p7)
}
  0x11   :  { %s264_s22 = smov 128   ;;  %s265_s23 = smov 8  }
  0x12   :  { %22 = dma.hbm_to_vmem [thread:$0]  %s340_s0, 256, %s17_s13, [#allocation3], %s264_s22, %s264_s22, %s265_s23  }
  0x13   :  { %s266_s26 = smov [#allocation5]   ;;  %s213_s30 = scalar_lea.hbm %s341_s1, 512 }
  0x14   :  { %s28_s27 = sshll.u32 %s266_s26, 4  ;;  %p214_p8 = scmp.ne.s32.totalorder %s341_s1, %s213_s30  ;;  %s29_s27 = int_to_ptr.vmem [resolvable:$true] %s28_s27 }
  0x15   :  { %p217_p9 = scmp.lt.u32.totalorder %s213_s30, %s341_s1 }
  0x17   :  { %p219_p10 = pnand %p217_p9, %p214_p8 }
  0x19   :  { %222 = shalt.err (!%p219_p10)
}
  0x1a   :  { %s223_s8 = scalar_lea.vmem %s29_s27, 512  ;;  %p228_p12 = scmp.lt.s32.totalorder %s29_s27, %s29_s27 }
  0x1b   :  { %p224_p11 = scmp.ne.s32.totalorder %s29_s27, %s223_s8  ;;  %p229_p13 = scmp.lt.s32.totalorder %s223_s8, %s223_s8 }
  0x1d   :  { %p230_p0 = por %p229_p13, %p228_p12 }
  0x1f   :  { %p231_p1 = pnand %p230_p0, %p224_p11 }
  0x21   :  { %234 = shalt.err (!%p231_p1)
}
  0x22   :  { %34 = dma.hbm_to_vmem [thread:$0]  %s341_s1, 512, %s29_s27, [#allocation6], %s264_s22, %s264_s22, %s265_s23  }
  0x23   :  { %257 = dma.done.wait [#allocation3], 256  }
  0x24   :  { %258 = vsyncadd [#allocation3], 4294967040 }
  0x25   :  { %259 = dma.done.wait [#allocation6], 512  }
  0x26   :  { %260 = vsyncadd [#allocation6], 4294966784  ;;  %vm56_vm0 = vcmask 261120   ;;  %v45_v0 = vld [vmem:[#allocation5] sm:$0xff]  ;;  %v46_v1 = vld [vmem:[#allocation5 + $0x8] sm:$0xff]  ;;  %s267_s11 = smov [#allocation7]  }
  0x27   :  { %v47_v2 = vld [vmem:[#allocation5 + $0x10] sm:$0xff]  ;;  %v178_v3 = vpack.c.bf16 %v46_v1, %v45_v0  ;;  %v48_v4 = vld [vmem:[#allocation5 + $0x18] sm:$0xff]  ;;  %s145_s12 = sshll.u32 %s267_s11, 4  ;;  %s146_s12 = int_to_ptr.vmem [resolvable:$true] %s145_s12 }
  0x28   :  { %v43_v5 = vld [vmem:[#allocation2] sm:$0xff]  ;;  %v182_v6 = vpack.c.bf16 %v48_v4, %v47_v2  ;;  %v44_v7 = vld [vmem:[#allocation2 + $0x8] sm:$0xff]  ;;  %s235_s13 = scalar_lea.vmem %s146_s12, 256  ;;  %p240_p3 = scmp.lt.s32.totalorder %s146_s12, %s146_s12 }
  0x29   :  { %175 = vmatprep.mubr.msk.f32.mxu0 %vm56_vm0, %v43_v5  ;;  %179 = vmatprep.subr.bf16.mxu0 %v178_v3  ;;  %v158_v8 = vld [vmem:[%s342_s2] ss:$0 sm:$0xff]  ;;  %p236_p2 = scmp.ne.s32.totalorder %s146_s12, %s235_s13  ;;  %p241_p4 = scmp.lt.s32.totalorder %s235_s13, %s235_s13 }
  0x2a   :  { %181 = vmatpush3.bf16.msra.mxu0 %v178_v3 }
  0x2b   :  { %183 = vmatprep.subr.bf16.mxu0 %v182_v6  ;;  %p242_p5 = por %p241_p4, %p240_p3 }
  0x2d   :  { %p243_p6 = pnand %p242_p5, %p236_p2 }
  0x2e   :  { %185 = vmatpush3.bf16.msra.mxu0 %v182_v6 }
  0x31   :  { %176 = vmatmul.mubr.msk.f32.vlgmr.msra.gmra.mrb[0].mxu0 %vm56_vm0, %v44_v7 }
 0x104   :  { %v177_v9 = vpop.f32.mrb[0].mxu0 }
 0x105   :  { %v135_v10 = vadd.f32 %v177_v9, %v158_v8  ;;  %v129_v11 = vpop.f32.mrb[1].mxu0 }
 0x106   :  { %v130_v12 = vadd.f32 %v158_v8, %v129_v11 }
 0x107   :  { %139 = vst.msk [vmem:[#allocation7 + $0x8] sm:$0xff] %vm56_vm0, %v135_v10 }
 0x108   :  { %138 = vst.msk [vmem:[#allocation7] sm:$0xff] %vm56_vm0, %v130_v12 }
 0x109   :  { %246 = shalt.err (!%p243_p6)
}
 0x10a   :  { %s247_s15 = scalar_lea.hbm %s343_s3, 256 }
 0x10b   :  { %p248_p7 = scmp.ne.s32.totalorder %s343_s3, %s247_s15  ;;  %p251_p8 = scmp.lt.u32.totalorder %s247_s15, %s343_s3 }
 0x10d   :  { %p253_p9 = pnand %p251_p8, %p248_p7 }
 0x10f   :  { %256 = shalt.err (!%p253_p9)
}
 0x110   :  { %151 = dma.vmem_to_hbm [thread:$0]  %s146_s12, 256, %s343_s3, [#allocation4], %s264_s22, %s264_s22, %s265_s23  }
 0x111   :  { %261 = dma.done.wait [#allocation4], 256  }
 0x112   :  { %262 = vsyncadd [#allocation4], 4294967040 }
 0x113   :  { %155 = vsyncpa [#allocation3], 1 }
 0x114   :  { %156 = vsyncpa [#allocation6], 1 }
 0x115   :  { %157 = vsyncpa [#allocation4], 1 }

</bundles_post_ra>
